<compile_context>
chip_gen: v6e
topology: v6e:2x2x1
jax: 0.10.0
libtpu: 0.0.40
codegen_flags: <defaults>
</compile_context>

<pallas_src>
import math

import jax
import jax.numpy as jnp
from jax.experimental import pallas as pl
from jax.experimental.pallas import tpu as pltpu


def _round_up(x, m):
    return (x + m - 1) // m * m


def _fit_tile(dim, target, granule):
    """Tile ~<= target, a multiple of `granule`, with small padding waste."""
    n_blocks = max(1, -(-dim // target))
    return _round_up(-(-dim // n_blocks), granule)


def _vmem_capacity_bytes():
    try:
        return pltpu.get_tpu_info().vmem_capacity_bytes
    except Exception:
        return 64 * 1024 * 1024  # conservative (v7x-sized) fallback


def _tile_targets(vmem_bytes):
    """(tm, tn, tk) targets + scoped-VMEM limit, sized per generation."""
    if vmem_bytes >= 100 * 1024 * 1024:
        # v5e / v6e (128 MiB physical).  1024x2048 output tile, tk=1024:
        # ~36 MiB double-buffered -> above the v6e ridge (~680 FLOP/B).
        return (1024, 2048, 1024), 64 * 1024 * 1024
    # v7x (64 MiB physical per TC).  1024x1024x1024: ~20 MiB double-buffered,
    # well above the v7x ridge with headroom for both TCs.
    return (1024, 1024, 1024), 44 * 1024 * 1024


def _synapse_fc_kernel(x_ref, w_ref, b_ref, o_ref, acc_ref):
    # x_ref  : (tm, tk) bf16 flattened-spike tile
    # w_ref  : (tk, tn) bf16 weight tile in (K, N) layout (lane = N, MXU-native)
    # b_ref  : (1,  tn) f32 bias tile
    # o_ref  : (tm, tn) output tile (caller dtype)
    # acc_ref: (tm, tn) f32 accumulator scratch, resident across the K axis
    k = pl.program_id(2)

    prod = jnp.dot(x_ref[...], w_ref[...], preferred_element_type=jnp.float32)

    @pl.when(k == 0)
    def _():
        acc_ref[...] = prod  # direct write: no zero-store + full-tile add

    @pl.when(k > 0)
    def _():
        acc_ref[...] += prod

    @pl.when(k == pl.num_programs(2) - 1)
    def _():
        o_ref[...] = (acc_ref[...] + b_ref[...]).astype(o_ref.dtype)


def prepare_synapse_fc_params(weight, bias):
    """One-time parameter prep, hoisted out of forward.

    weight: (out_features, in_features) f32 (PyTorch nn.Linear convention)
    bias  : (out_features,)
    returns (w_kn, b_row) = ((K, N) bf16 weight, (1, N) f32 bias)
    """
    w_kn = jnp.asarray(weight).T.astype(jnp.bfloat16)  # one XLA pass: T + cast
    b_row = jnp.asarray(bias).astype(jnp.float32).reshape(1, -1)
    return w_kn, b_row


def synapse_fc_forward(spike, w_kn, b_row, *, allow_fallback=True,
                       min_pallas_flops=2 * (1 << 24)):
    """Pallas implementation of SYNAPSE_FC.forward (sstep=False path).

    spike: (T, B, in_features)      -- T must equal module TIME
    w_kn : (in_features, out_features) bf16   (from prepare_synapse_fc_params)
    b_row: (1, out_features) f32
    returns (T, B, out_features) in spike.dtype
    """
    T, B, K = spike.shape
    K2, N = w_kn.shape
    assert K == K2 and b_row.shape == (1, N)
    out_dtype = spike.dtype
    M = T * B

    if allow_fallback and 2 * M * N * K < min_pallas_flops:
        # Tiny problem: a single fused XLA dot beats Pallas fixed overhead.
        x = spike.reshape(M, K).astype(jnp.bfloat16)
        y = jnp.dot(x, w_kn, preferred_element_type=jnp.float32) + b_row
        return y.astype(out_dtype).reshape(T, B, N)

    (tm_t, tn_t, tk_t), vmem_limit = _tile_targets(_vmem_capacity_bytes())

    # bf16 operands: sublane granule 16, lane granule 128.  Tiles are fitted
    # to the problem so ragged dims don't blow up padded work.
    tm = _fit_tile(M, tm_t, 16)
    tk = _fit_tile(K, tk_t, 128)
    tn = _fit_tile(N, tn_t, 128)

    Mp = _round_up(M, tm)
    Kp = _round_up(K, tk)
    Np = _round_up(N, tn)

    # Spikes are exactly 0/1 -> bf16 is lossless for x; weights already bf16.
    x2d = spike.reshape(M, K).astype(jnp.bfloat16)
    w2d = w_kn
    b2d = b_row
    if (Mp, Kp) != (M, K):
        x2d = jnp.pad(x2d, ((0, Mp - M), (0, Kp - K)))
    if (Kp, Np) != (K, N):
        w2d = jnp.pad(w2d, ((0, Kp - K), (0, Np - N)))
    if Np != N:
        b2d = jnp.pad(b2d, ((0, 0), (0, Np - N)))

    grid = (Mp // tm, Np // tn, Kp // tk)
    out_isize = jnp.dtype(out_dtype).itemsize

    cost = pl.CostEstimate(
        flops=2 * Mp * Np * Kp,
        transcendentals=0,
        bytes_accessed=(
            Mp * Kp * 2 * grid[1]      # x re-fetched once per N tile
            + Kp * Np * 2 * grid[0]    # w re-fetched once per M tile
            + Np * 4 * grid[0]         # bias
            + Mp * Np * out_isize      # output written once
        ),
    )

    out2d = pl.pallas_call(
        _synapse_fc_kernel,
        out_shape=jax.ShapeDtypeStruct((Mp, Np), out_dtype),
        grid_spec=pltpu.PrefetchScalarGridSpec(
            num_scalar_prefetch=0,
            grid=grid,
            in_specs=[
                pl.BlockSpec((tm, tk), lambda i, j, k: (i, k)),   # spikes
                pl.BlockSpec((tk, tn), lambda i, j, k: (k, j)),   # weight (K,N)
                pl.BlockSpec((1, tn), lambda i, j, k: (0, j)),    # bias
            ],
            out_specs=pl.BlockSpec((tm, tn), lambda i, j, k: (i, j)),
            scratch_shapes=[pltpu.VMEM((tm, tn), jnp.float32)],
        ),
        compiler_params=pltpu.CompilerParams(
            # M, N independent (megacore-shardable on v7x); K is the reduction.
            dimension_semantics=("parallel", "parallel", "arbitrary"),
            vmem_limit_bytes=vmem_limit,
        ),
        cost_estimate=cost,
    )(x2d, w2d, b2d)

    if (Mp, Np) != (M, N):
        out2d = out2d[:M, :N]
    return out2d.reshape(T, B, N)


def _init_linear_params(key, in_features, out_features, dtype=jnp.float32):
    # Deterministic init mimicking nn.Linear: U(-1/sqrt(in), 1/sqrt(in)).
    kw, kb = jax.random.split(key)
    bound = 1.0 / math.sqrt(in_features)
    weight = jax.random.uniform(
        kw, (out_features, in_features), dtype=dtype, minval=-bound, maxval=bound
    )
    bias = jax.random.uniform(
        kb, (out_features,), dtype=dtype, minval=-bound, maxval=bound
    )
    return weight, bias


def _reference(spike, weight, bias):
    # Reference matching the kernel's numerics: bf16 operands, f32 accumulate.
    T, B, K = spike.shape
    N = weight.shape[0]
    x = spike.reshape(T * B, K).astype(jnp.bfloat16).astype(jnp.float32)
    w = weight.astype(jnp.bfloat16).astype(jnp.float32)
    y = (
        jnp.dot(x, w.T, precision=jax.lax.Precision.HIGHEST)
        + bias.astype(jnp.float32)
    )
    return y.reshape(T, B, N).astype(spike.dtype)


if __name__ == "__main__":
    key = jax.random.PRNGKey(0)

    # --- case 1: module defaults (TIME=8), MXU-friendly feature sizes ---
    TIME, B, IN_F, OUT_F = 8, 2, 128, 128
    k_spike, k_params, key = jax.random.split(key, 3)
    spike = (jax.random.uniform(k_spike, (TIME, B, IN_F)) > 0.5).astype(jnp.float32)
    weight, bias = _init_linear_params(k_params, IN_F, OUT_F)
    w_kn, b_row = prepare_synapse_fc_params(weight, bias)  # hoisted, done once

    # 1a: small-problem fallback path (tiny M*N*K -> fused XLA dot).
    out_fb = jax.block_until_ready(
        synapse_fc_forward(spike, w_kn, b_row, allow_fallback=True)
    )
    ref = _reference(spike, weight, bias)
    assert out_fb.shape == (TIME, B, OUT_F)
    assert jnp.allclose(out_fb, ref, atol=1e-3, rtol=1e-3)

    # 1b: same shapes, forced through the Pallas kernel (aligned dims).
    out_pk = jax.block_until_ready(
        synapse_fc_forward(spike, w_kn, b_row, allow_fallback=False)
    )
    assert out_pk.shape == (TIME, B, OUT_F)
    assert jnp.allclose(out_pk, ref, atol=1e-3, rtol=1e-3)

    # --- case 2: ragged shapes exercise the padding / tail handling ---
    TIME2, B2, IN_F2, OUT_F2 = 8, 3, 100, 72
    k_spike2, k_params2, key = jax.random.split(key, 3)
    spike2 = (jax.random.uniform(k_spike2, (TIME2, B2, IN_F2)) > 0.5).astype(
        jnp.float32
    )
    weight2, bias2 = _init_linear_params(k_params2, IN_F2, OUT_F2)
    w_kn2, b_row2 = prepare_synapse_fc_params(weight2, bias2)

    out2 = jax.block_until_ready(
        synapse_fc_forward(spike2, w_kn2, b_row2, allow_fallback=False)
    )
    ref2 = _reference(spike2, weight2, bias2)
    assert out2.shape == (TIME2, B2, OUT_F2)
    assert jnp.allclose(out2, ref2, atol=1e-3, rtol=1e-3)

    print("KERNEL_OK")
</pallas_src>

<mosaic_0001>
module attributes {stable_mosaic.version = 11 : i64} {
  func.func @_synapse_fc_kernel(%arg0: i32, %arg1: i32, %arg2: i32, %arg3: memref<16x128xbf16, #tpu.memory_space<vmem>>, %arg4: memref<128x128xbf16, #tpu.memory_space<vmem>>, %arg5: memref<1x128xf32, #tpu.memory_space<vmem>>, %arg6: memref<16x128xf32, #tpu.memory_space<vmem>>, %arg7: memref<16x128xf32, #tpu.memory_space<vmem>>) attributes {dimension_semantics = [#tpu.dimension_semantics<parallel>, #tpu.dimension_semantics<parallel>, #tpu.dimension_semantics<arbitrary>], iteration_bounds = array<i64: 1, 1, 1>, scalar_prefetch = 0 : i64, scratch_operands = 1 : i64, tpu.core_type = #tpu.core_type<tc>, window_params = [{transform_indices = @transform_0, window_bounds = array<i64: 16, 128>}, {transform_indices = @transform_1, window_bounds = array<i64: 128, 128>}, {transform_indices = @transform_2, window_bounds = array<i64: 1, 128>}, {transform_indices = @transform_3, window_bounds = array<i64: 16, 128>}]} {
    %c0 = arith.constant 0 : index
    %c0_0 = arith.constant 0 : index
    %0 = vector.load %arg3[%c0, %c0_0] : memref<16x128xbf16, #tpu.memory_space<vmem>>, vector<16x128xbf16>
    %c0_1 = arith.constant 0 : index
    %c0_2 = arith.constant 0 : index
    %1 = vector.load %arg4[%c0_1, %c0_2] : memref<128x128xbf16, #tpu.memory_space<vmem>>, vector<128x128xbf16>
    %cst = arith.constant dense<0.000000e+00> : vector<16x128xf32>
    %2 = tpu.matmul %0, %1, %cst {dimension_numbers = #tpu.dot_dimension_numbers<[1], [0], [0], [1], [0, 0, 1, 1], [], []>} : vector<16x128xbf16>, vector<128x128xbf16>, vector<16x128xf32> -> vector<16x128xf32>
    %c0_i32 = arith.constant 0 : i32
    %3 = arith.cmpi eq, %arg2, %c0_i32 : i32
    %4 = arith.extui %3 : i1 to i32
    %c0_i32_3 = arith.constant 0 : i32
    %5 = arith.cmpi ne, %4, %c0_i32_3 : i32
    scf.if %5 {
      %c0_8 = arith.constant 0 : index
      %c0_9 = arith.constant 0 : index
      %12 = vector.load %arg7[%c0_8, %c0_9] : memref<16x128xf32, #tpu.memory_space<vmem>>, vector<16x128xf32>
      tpu.vector_store %arg7[%c0_8, %c0_9], %2 {strides = array<i32>} : memref<16x128xf32, #tpu.memory_space<vmem>>, vector<16x128xf32>,
    } else {
    }
    %c0_i32_4 = arith.constant 0 : i32
    %6 = arith.cmpi sgt, %arg2, %c0_i32_4 : i32
    %7 = arith.extui %6 : i1 to i32
    %c0_i32_5 = arith.constant 0 : i32
    %8 = arith.cmpi ne, %7, %c0_i32_5 : i32
    scf.if %8 {
      %c0_8 = arith.constant 0 : index
      %c0_9 = arith.constant 0 : index
      %12 = vector.load %arg7[%c0_8, %c0_9] : memref<16x128xf32, #tpu.memory_space<vmem>>, vector<16x128xf32>
      %13 = arith.addf %12, %2 : vector<16x128xf32>
      %c0_10 = arith.constant 0 : index
      %c0_11 = arith.constant 0 : index
      %14 = vector.load %arg7[%c0_10, %c0_11] : memref<16x128xf32, #tpu.memory_space<vmem>>, vector<16x128xf32>
      tpu.vector_store %arg7[%c0_10, %c0_11], %13 {strides = array<i32>} : memref<16x128xf32, #tpu.memory_space<vmem>>, vector<16x128xf32>,
    } else {
    }
    %c0_i32_6 = arith.constant 0 : i32
    %9 = arith.cmpi eq, %arg2, %c0_i32_6 : i32
    %10 = arith.extui %9 : i1 to i32
    %c0_i32_7 = arith.constant 0 : i32
    %11 = arith.cmpi ne, %10, %c0_i32_7 : i32
    scf.if %11 {
      %c0_8 = arith.constant 0 : index
      %c0_9 = arith.constant 0 : index
      %12 = vector.load %arg7[%c0_8, %c0_9] : memref<16x128xf32, #tpu.memory_space<vmem>>, vector<16x128xf32>
      %c0_10 = arith.constant 0 : index
      %c0_11 = arith.constant 0 : index
      %13 = vector.load %arg5[%c0_10, %c0_11] : memref<1x128xf32, #tpu.memory_space<vmem>>, vector<1x128xf32>
      %14 = vector.broadcast %13 : vector<1x128xf32> to vector<16x128xf32>
      %15 = arith.addf %12, %14 : vector<16x128xf32>
      %c0_12 = arith.constant 0 : index
      %c0_13 = arith.constant 0 : index
      %16 = vector.load %arg6[%c0_12, %c0_13] : memref<16x128xf32, #tpu.memory_space<vmem>>, vector<16x128xf32>
      tpu.vector_store %arg6[%c0_12, %c0_13], %15 {strides = array<i32>} : memref<16x128xf32, #tpu.memory_space<vmem>>, vector<16x128xf32>,
    } else {
    }
    return
  }
  func.func @transform_0(%arg0: i32, %arg1: i32, %arg2: i32) -> (i32, i32) {
    %c0_i32 = arith.constant 0 : i32
    return %arg0, %arg2 : i32, i32
  }
  func.func @transform_1(%arg0: i32, %arg1: i32, %arg2: i32) -> (i32, i32) {
    %c0_i32 = arith.constant 0 : i32
    return %arg2, %arg1 : i32, i32
  }
  func.func @transform_2(%arg0: i32, %arg1: i32, %arg2: i32) -> (i32, i32) {
    %c0_i32 = arith.constant 0 : i32
    %c0_i32_0 = arith.constant 0 : i32
    return %c0_i32, %arg1 : i32, i32
  }
  func.func @transform_3(%arg0: i32, %arg1: i32, %arg2: i32) -> (i32, i32) {
    %c0_i32 = arith.constant 0 : i32
    return %arg0, %arg1 : i32, i32
  }
}

</mosaic_0001>

<bundles_post_ra>
// kernel: tpu_custom_call.1
= control target key start
LH: loop header
LB: loop body
LE: loop exit
PB: predicated region body
PF: predicated region fallthrough
CT: control target
= control target key end

     0   :  { %8 = vsyncpa [#allocation4], 0  ;;  %s371_s0 = inlined_call_operand.hbm [shape: bf16[16,128], index: 0, kind: input, shape index: {}]   ;;  %s372_s1 = inlined_call_operand.hbm [shape: bf16[128,128], index: 1, kind: input, shape index: {}]   ;;  %s373_s2 = inlined_call_operand.vmem [shape: f32[1,128], index: 2, kind: input, shape index: {}]   ;;  %s374_s3 = inlined_call_operand.hbm [shape: f32[16,128], index: 3, kind: output, shape index: {}]  }
   0x1   :  { %9 = vsyncpa [#allocation7], 0 }
   0x2   :  { %10 = vsyncpa [#allocation5], 0  ;;  %s330_s12 = smov [#allocation3]  }
   0x3   :  { %s16_s13 = sshll.u32 %s330_s12, 4  ;;  %s17_s13 = int_to_ptr.vmem [resolvable:$true] %s16_s13 }
   0x4   :  { %s272_s14 = scalar_lea.vmem %s17_s13, 128  ;;  %p277_p1 = scmp.lt.s32.totalorder %s17_s13, %s17_s13 }
   0x5   :  { %p273_p0 = scmp.ne.s32.totalorder %s17_s13, %s272_s14  ;;  %p278_p2 = scmp.lt.s32.totalorder %s272_s14, %s272_s14 }
   0x7   :  { %p279_p3 = por %p278_p2, %p277_p1 }
   0x9   :  { %p280_p4 = pnand %p279_p3, %p273_p0 }
   0xb   :  { %283 = shalt.err (!%p280_p4)
}
   0xc   :  { %s331_s15 = smov 64   ;;  %s332_s16 = smov 4  }
   0xd   :  { %22 = dma.hbm_to_vmem [thread:$0]  %s371_s0, 128, %s17_s13, [#allocation4], %s331_s15, %s331_s15, %s332_s16  }
   0xe   :  { %s333_s19 = smov [#allocation6]  }
   0xf   :  { %s28_s20 = sshll.u32 %s333_s19, 4  ;;  %s29_s20 = int_to_ptr.vmem [resolvable:$true] %s28_s20 }
  0x10   :  { %s292_s21 = scalar_lea.vmem %s29_s20, 1024  ;;  %p297_p6 = scmp.lt.s32.totalorder %s29_s20, %s29_s20 }
  0x11   :  { %p293_p5 = scmp.ne.s32.totalorder %s29_s20, %s292_s21  ;;  %p298_p7 = scmp.lt.s32.totalorder %s292_s21, %s292_s21 }
  0x13   :  { %p299_p8 = por %p298_p7, %p297_p6 }
  0x15   :  { %p300_p9 = pnand %p299_p8, %p293_p5 }
  0x17   :  { %303 = shalt.err (!%p300_p9)
}
  0x18   :  { %34 = dma.hbm_to_vmem [thread:$0]  %s372_s1, 1024, %s29_s20, [#allocation7], %s331_s15, %s331_s15, %s332_s16  }
  0x19   :  { %324 = dma.done.wait [#allocation4], 128  }
  0x1a   :  { %325 = vsyncadd [#allocation4], 4294967168 }
  0x1b   :  { %326 = dma.done.wait [#allocation7], 1024  }
  0x1c   :  { %327 = vsyncadd [#allocation7], 4294966272  ;;  %v334_v0 = vmov 0.0   ;;  %vm335_vm0 = vmmov 0   ;;  %v255_v1 = vld [vmem:[#allocation6 + $0x38] sm:$0xff]   ;;  %v256_v2 = vld [vmem:[#allocation6 + $0x30] sm:$0xff]  }
  0x1d   :  { %226 = vmatprep.subr.bf16.mxu0 %v334_v0  ;;  %242 = vmatprep.mubr.msk.bf16.mxu0 %vm335_vm0, %v334_v0  ;;  %v257_v3 = vld [vmem:[#allocation6 + $0x28] sm:$0xff]   ;;  %v258_v4 = vld [vmem:[#allocation6 + $0x20] sm:$0xff]   ;;  %v259_v5 = vld [vmem:[#allocation6 + $0x18] sm:$0xff]   ;;  %s336_s24 = smov [#allocation8]  }
  0x1e   :  { %227 = vmatpush3.bf16.msra.mxu0 %v255_v1  ;;  %v260_v6 = vld [vmem:[#allocation6 + $0x10] sm:$0xff]   ;;  %v261_v7 = vld [vmem:[#allocation6 + $0x8] sm:$0xff]   ;;  %v262_v8 = vld [vmem:[#allocation6] sm:$0xff]   ;;  %s194_s25 = sshll.u32 %s336_s24, 4  ;;  %s195_s25 = int_to_ptr.vmem [resolvable:$true] %s194_s25 }
  0x1f   :  { %228 = vmatprep.subr.bf16.mxu0 %v334_v0  ;;  %v263_v9 = vld [vmem:[#allocation3] sm:$0xff]   ;;  %s304_s26 = scalar_lea.vmem %s195_s25, 256  ;;  %p309_p11 = scmp.lt.s32.totalorder %s195_s25, %s195_s25 }
  0x20   :  { %v216_v10 = vld [vmem:[%s373_s2] ss:$0 sm:$0xff]  ;;  %p305_p10 = scmp.ne.s32.totalorder %s195_s25, %s304_s26  ;;  %p310_p12 = scmp.lt.s32.totalorder %s304_s26, %s304_s26 }
  0x22   :  { %229 = vmatpush3.bf16.msra.mxu0 %v256_v2  ;;  %p311_p13 = por %p310_p12, %p309_p11 }
  0x23   :  { %230 = vmatprep.subr.bf16.mxu0 %v334_v0 }
  0x24   :  { %p312_p0 = pnand %p311_p13, %p305_p10 }
  0x26   :  { %231 = vmatpush3.bf16.msra.mxu0 %v257_v3 }
  0x27   :  { %232 = vmatprep.subr.bf16.mxu0 %v334_v0 }
  0x2a   :  { %233 = vmatpush3.bf16.msra.mxu0 %v258_v4 }
  0x2b   :  { %234 = vmatprep.subr.bf16.mxu0 %v334_v0 }
  0x2e   :  { %235 = vmatpush3.bf16.msra.mxu0 %v259_v5 }
  0x2f   :  { %236 = vmatprep.subr.bf16.mxu0 %v334_v0 }
  0x32   :  { %237 = vmatpush3.bf16.msra.mxu0 %v260_v6 }
  0x33   :  { %238 = vmatprep.subr.bf16.mxu0 %v334_v0 }
  0x36   :  { %239 = vmatpush3.bf16.msra.mxu0 %v261_v7 }
  0x37   :  { %240 = vmatprep.subr.bf16.mxu0 %v334_v0 }
  0x3a   :  { %241 = vmatpush3.bf16.msra.mxu0 %v262_v8 }
  0x3d   :  { %243 = vmatmul.mubr.bf16.vlgmr.msra.gmra.mxu0 %v263_v9 }
  0xfd   :  { %v150_v11 = vpop.f32.mrf.mxu0 }
  0xfe   :  { %v185_v12 = vadd.f32 %v216_v10, %v150_v11 }
  0xff   :  { %v244_v13 = vpop.f32.mrf.mxu0 }
 0x100   :  { %187 = vst [vmem:[#allocation8] sm:$0xff] %v185_v12 }
 0x101   :  { %v153_v14 = vpop.f32.mrf.mxu0 }
 0x102   :  { %v186_v15 = vadd.f32 %v216_v10, %v153_v14 }
 0x103   :  { %v245_v16 = vpop.f32.mrf.mxu0 }
 0x104   :  { %188 = vst [vmem:[#allocation8 + $0x8] sm:$0xff] %v186_v15 }
 0x105   :  { %315 = shalt.err (!%p312_p0)
}
 0x106   :  { %s337_s27 = smov 128   ;;  %s338_s2 = smov 8  }
 0x107   :  { %200 = dma.vmem_to_hbm [thread:$0]  %s195_s25, 256, %s374_s3, [#allocation5], %s337_s27, %s337_s27, %s338_s2  }
 0x108   :  { %328 = dma.done.wait [#allocation5], 256  }
 0x109   :  { %329 = vsyncadd [#allocation5], 4294967040 }
 0x10a   :  { %204 = vsyncpa [#allocation4], 1 }
 0x10b   :  { %205 = vsyncpa [#allocation7], 1 }
 0x10c   :  { %206 = vsyncpa [#allocation5], 1 }

</bundles_post_ra>
